<compile_context>
chip_gen: v7x
topology: tpu7x:2x2x1
jax: 0.10.0
libtpu: 0.0.40
codegen_flags: <defaults>
</compile_context>

<pallas_src>
import functools

import jax
import jax.numpy as jnp
from jax.experimental import pallas as pl
from jax.experimental.pallas import tpu as pltpu


def _round_up(v, m):
    return (v + m - 1) // m * m


# ----------------------------------------------------------------------------
# Fused kernel: one grid step == one GIN layer.  X lives in a VMEM scratch.
# ----------------------------------------------------------------------------
def gin_fused_kernel(a_ref, x0_ref, w1_ref, g1_ref, b1_ref,
                     w2_ref, g2_ref, b2_ref, o_ref, x_scr,
                     *, n_real, eps, last_activation):
    l = pl.program_id(0)
    n_layers = pl.num_programs(0)
    n_pad = x_scr.shape[0]
    h_pad = o_ref.shape[1]

    # Layer 0: bring the (padded) input features into the resident scratch.
    @pl.when(l == 0)
    def _():
        x_scr[...] = x0_ref[...]

    x = x_scr[...]                                          # (N_pad, D) f32

    # --- GIN sum aggregation + (1+eps) self term (bf16 MXU, f32 accumulate).
    agg = jnp.dot(a_ref[...], x.astype(jnp.bfloat16),
                  preferred_element_type=jnp.float32)
    z = agg + (1.0 + eps) * x

    # --- training-mode BatchNorm1d over the node (batch) axis, eps=1e-5.
    #     Padded rows are masked out of the statistics when N was padded.
    if n_real == n_pad:
        def bn(h, gamma, beta):
            mean = jnp.mean(h, axis=0, keepdims=True)
            var = jnp.mean((h - mean) * (h - mean), axis=0, keepdims=True)
            return (h - mean) * jax.lax.rsqrt(var + 1e-5) * gamma + beta
    else:
        row_mask = (jax.lax.broadcasted_iota(jnp.int32, (n_pad, 1), 0)
                    < n_real).astype(jnp.float32)
        inv_n = 1.0 / float(n_real)

        def bn(h, gamma, beta):
            mean = jnp.sum(h * row_mask, axis=0, keepdims=True) * inv_n
            d = (h - mean)
            var = jnp.sum(d * d * row_mask, axis=0, keepdims=True) * inv_n
            return d * jax.lax.rsqrt(var + 1e-5) * gamma + beta

    # --- GINConv inner MLP: Linear1 -> BN -> ReLU -> Linear2
    #     (Linear biases dropped: cancelled by the following BN's mean sub.)
    h = jnp.dot(z.astype(jnp.bfloat16), w1_ref[...],
                preferred_element_type=jnp.float32)
    h = jnp.maximum(bn(h, g1_ref[...], b1_ref[...]), 0.0)
    h = jnp.dot(h.astype(jnp.bfloat16), w2_ref[...],
                preferred_element_type=jnp.float32)

    # --- outer BatchNorm + (conditionally skipped) activation + dropout(id).
    h = bn(h, g2_ref[...], b2_ref[...])
    if last_activation:
        h = jnp.maximum(h, 0.0)
    else:
        h = jnp.where(l < n_layers - 1, jnp.maximum(h, 0.0), h)
    # dropout: eval-mode identity (see TODO at top)

    # keep features resident for the next layer; emit output on the last one.
    x_scr[:, :h_pad] = h

    @pl.when(l == n_layers - 1)
    def _():
        o_ref[...] = h.astype(o_ref.dtype)


# ----------------------------------------------------------------------------
# Wrapper: pad/stack parameters, build dense sum-aggregation matrix, one call.
# ----------------------------------------------------------------------------
def gin_encoder_forward(x, edge_index, params, *, last_activation=True,
                        eps=0.0):
    n, d_in = x.shape
    hidden = params[0][0].shape[1]
    layer_num = len(params)

    n_pad = _round_up(max(n, 8), 8)            # sublane-aligned node count
    h_pad = _round_up(hidden, 128)             # lane-dense channel width
    d_pad = max(_round_up(d_in, 128), h_pad)   # common stacked-weight in-dim

    # padded node features (zeros in padded rows/cols)
    x_p = jnp.zeros((n_pad, d_pad), jnp.float32)
    x_p = x_p.at[:n, :d_in].set(x.astype(jnp.float32))

    # dense GIN sum-aggregation matrix: A[i, j] = #edges j -> i (duplicates
    # add, matching PyG scatter-add).  bf16 halves its HBM/VMEM footprint.
    src, dst = edge_index[0], edge_index[1]
    a = jnp.zeros((n_pad, n_pad), jnp.float32).at[dst, src].add(1.0)
    a = a.astype(jnp.bfloat16)

    # pad + stack per-layer parameters so one grid axis walks the layers.
    w1s, g1s, b1s, w2s, g2s, b2s = [], [], [], [], [], []
    for (w1, g1, b1, w2, g2, b2) in params:
        w1p = jnp.zeros((d_pad, h_pad), jnp.float32)
        w1p = w1p.at[:w1.shape[0], :w1.shape[1]].set(w1)
        w2p = jnp.zeros((h_pad, h_pad), jnp.float32)
        w2p = w2p.at[:w2.shape[0], :w2.shape[1]].set(w2)
        g1p = jnp.ones((1, h_pad), jnp.float32).at[:, :hidden].set(g1.reshape(1, -1))
        b1p = jnp.zeros((1, h_pad), jnp.float32).at[:, :hidden].set(b1.reshape(1, -1))
        g2p = jnp.ones((1, h_pad), jnp.float32).at[:, :hidden].set(g2.reshape(1, -1))
        b2p = jnp.zeros((1, h_pad), jnp.float32).at[:, :hidden].set(b2.reshape(1, -1))
        w1s.append(w1p); w2s.append(w2p)
        g1s.append(g1p); b1s.append(b1p); g2s.append(g2p); b2s.append(b2p)

    W1 = jnp.stack(w1s).astype(jnp.bfloat16)   # (L, d_pad, h_pad)
    W2 = jnp.stack(w2s).astype(jnp.bfloat16)   # (L, h_pad, h_pad)
    G1 = jnp.stack(g1s)                        # (L, 1, h_pad) f32
    B1 = jnp.stack(b1s)
    G2 = jnp.stack(g2s)
    B2 = jnp.stack(b2s)

    kernel = functools.partial(gin_fused_kernel, n_real=n, eps=eps,
                               last_activation=last_activation)

    out_pad = pl.pallas_call(
        kernel,
        out_shape=jax.ShapeDtypeStruct((n_pad, h_pad), jnp.float32),
        grid_spec=pltpu.PrefetchScalarGridSpec(
            num_scalar_prefetch=0,
            grid=(layer_num,),
            in_specs=[
                pl.BlockSpec((n_pad, n_pad), lambda l: (0, 0)),          # A
                pl.BlockSpec((n_pad, d_pad), lambda l: (0, 0)),          # X0
                pl.BlockSpec((None, d_pad, h_pad), lambda l: (l, 0, 0)),  # W1[l]
                pl.BlockSpec((None, 1, h_pad), lambda l: (l, 0, 0)),      # gamma_mlp[l]
                pl.BlockSpec((None, 1, h_pad), lambda l: (l, 0, 0)),      # beta_mlp[l]
                pl.BlockSpec((None, h_pad, h_pad), lambda l: (l, 0, 0)),  # W2[l]
                pl.BlockSpec((None, 1, h_pad), lambda l: (l, 0, 0)),      # gamma_out[l]
                pl.BlockSpec((None, 1, h_pad), lambda l: (l, 0, 0)),      # beta_out[l]
            ],
            out_specs=pl.BlockSpec((n_pad, h_pad), lambda l: (0, 0)),
            scratch_shapes=[pltpu.VMEM((n_pad, d_pad), jnp.float32)],
        ),
        compiler_params=pltpu.CompilerParams(
            dimension_semantics=("arbitrary",)),   # layers are sequential
    )(a, x_p, W1, G1, B1, W2, G2, B2)

    return out_pad[:n, :hidden]


# ----------------------------------------------------------------------------
# Deterministic parameter init (glorot-uniform linears, BN gamma=1 / beta=0).
# ----------------------------------------------------------------------------
def init_params(key, input_dim, hidden_size, layer_num):
    params = []
    d_in = input_dim
    for _ in range(layer_num):
        key, k1, k2 = jax.random.split(key, 3)
        lim1 = (6.0 / (d_in + hidden_size)) ** 0.5
        lim2 = (6.0 / (2 * hidden_size)) ** 0.5
        w1 = jax.random.uniform(k1, (d_in, hidden_size), jnp.float32,
                                -lim1, lim1)
        w2 = jax.random.uniform(k2, (hidden_size, hidden_size), jnp.float32,
                                -lim2, lim2)
        g1 = jnp.ones((hidden_size,), jnp.float32)
        b1 = jnp.zeros((hidden_size,), jnp.float32)
        g2 = jnp.ones((hidden_size,), jnp.float32)
        b2 = jnp.zeros((hidden_size,), jnp.float32)
        params.append((w1, g1, b1, w2, g2, b2))
        d_in = hidden_size
    return params


if __name__ == "__main__":
    key = jax.random.PRNGKey(0)

    num_nodes = 8
    input_dim = 16
    hidden_size = 128      # module default hidden_size; lane-dense (128)
    layer_num = 2

    k_x, k_p = jax.random.split(key)
    x = jax.random.normal(k_x, (num_nodes, input_dim), jnp.float32)

    # small directed ring + a few chords, symmetrized
    src = jnp.array([0, 1, 2, 3, 4, 5, 6, 7, 0, 2, 4, 6], dtype=jnp.int32)
    dst = jnp.array([1, 2, 3, 4, 5, 6, 7, 0, 4, 6, 0, 2], dtype=jnp.int32)
    edge_index = jnp.stack([jnp.concatenate([src, dst]),
                            jnp.concatenate([dst, src])], axis=0)

    params = init_params(k_p, input_dim, hidden_size, layer_num)

    out = gin_encoder_forward(x, edge_index, params, last_activation=True)
    out = jax.block_until_ready(out)
    assert out.shape == (num_nodes, hidden_size)
    assert jnp.all(jnp.isfinite(out))
    print("KERNEL_OK")
</pallas_src>

<mosaic_0001>
module attributes {stable_mosaic.version = 11 : i64} {
  func.func @gin_fused_kernel(%arg0: i32, %arg1: memref<8x8xbf16, #tpu.memory_space<vmem>>, %arg2: memref<8x128xf32, #tpu.memory_space<vmem>>, %arg3: memref<1x128x128xbf16, #tpu.memory_space<vmem>>, %arg4: memref<1x1x128xf32, #tpu.memory_space<vmem>>, %arg5: memref<1x1x128xf32, #tpu.memory_space<vmem>>, %arg6: memref<1x128x128xbf16, #tpu.memory_space<vmem>>, %arg7: memref<1x1x128xf32, #tpu.memory_space<vmem>>, %arg8: memref<1x1x128xf32, #tpu.memory_space<vmem>>, %arg9: memref<8x128xf32, #tpu.memory_space<vmem>>, %arg10: memref<8x128xf32, #tpu.memory_space<vmem>>) attributes {dimension_semantics = [#tpu.dimension_semantics<arbitrary>], iteration_bounds = array<i64: 2>, scalar_prefetch = 0 : i64, scratch_operands = 1 : i64, tpu.core_type = #tpu.core_type<tc>, window_params = [{pipeline_mode = #tpu.pipeline_mode<synchronous>, transform_indices = @transform_0, window_bounds = array<i64: 8, 8>}, {pipeline_mode = #tpu.pipeline_mode<synchronous>, transform_indices = @transform_1, window_bounds = array<i64: 8, 128>}, {transform_indices = @transform_2, window_bounds = array<i64: 1, 128, 128>}, {transform_indices = @transform_3, window_bounds = array<i64: 1, 1, 128>}, {transform_indices = @transform_4, window_bounds = array<i64: 1, 1, 128>}, {transform_indices = @transform_5, window_bounds = array<i64: 1, 128, 128>}, {transform_indices = @transform_6, window_bounds = array<i64: 1, 1, 128>}, {transform_indices = @transform_7, window_bounds = array<i64: 1, 1, 128>}, {pipeline_mode = #tpu.pipeline_mode<synchronous>, transform_indices = @transform_8, window_bounds = array<i64: 8, 128>}]} {
    %c0_i32 = arith.constant 0 : i32
    %0 = arith.cmpi eq, %arg0, %c0_i32 : i32
    %1 = arith.extui %0 : i1 to i32
    %c0_i32_0 = arith.constant 0 : i32
    %2 = arith.cmpi ne, %1, %c0_i32_0 : i32
    scf.if %2 {
      %c0_40 = arith.constant 0 : index
      %c0_41 = arith.constant 0 : index
      %82 = vector.load %arg2[%c0_40, %c0_41] : memref<8x128xf32, #tpu.memory_space<vmem>>, vector<8x128xf32>
      %c0_42 = arith.constant 0 : index
      %c0_43 = arith.constant 0 : index
      %83 = vector.load %arg10[%c0_42, %c0_43] : memref<8x128xf32, #tpu.memory_space<vmem>>, vector<8x128xf32>
      tpu.vector_store %arg10[%c0_42, %c0_43], %82 {strides = array<i32>} : memref<8x128xf32, #tpu.memory_space<vmem>>, vector<8x128xf32>,
    } else {
    }
    %c0 = arith.constant 0 : index
    %c0_1 = arith.constant 0 : index
    %3 = vector.load %arg10[%c0, %c0_1] : memref<8x128xf32, #tpu.memory_space<vmem>>, vector<8x128xf32>
    %c0_2 = arith.constant 0 : index
    %c0_3 = arith.constant 0 : index
    %4 = vector.load %arg1[%c0_2, %c0_3] : memref<8x8xbf16, #tpu.memory_space<vmem>>, vector<8x8xbf16>
    %5 = arith.truncf %3 : vector<8x128xf32> to vector<8x128xbf16>
    %cst = arith.constant dense<0.000000e+00> : vector<8x128xf32>
    %6 = tpu.matmul %4, %5, %cst {dimension_numbers = #tpu.dot_dimension_numbers<[1], [0], [0], [1], [0, 0, 1, 1], [], []>} : vector<8x8xbf16>, vector<8x128xbf16>, vector<8x128xf32> -> vector<8x128xf32>
    %cst_4 = arith.constant 1.000000e+00 : f32
    %7 = vector.broadcast %cst_4 : f32 to vector<8x128xf32>
    %8 = arith.mulf %7, %3 : vector<8x128xf32>
    %9 = arith.addf %6, %8 : vector<8x128xf32>
    %10 = arith.truncf %9 : vector<8x128xf32> to vector<8x128xbf16>
    %c0_5 = arith.constant 0 : index
    %c0_6 = arith.constant 0 : index
    %c0_7 = arith.constant 0 : index
    %11 = vector.load %arg3[%c0_5, %c0_6, %c0_7] : memref<1x128x128xbf16, #tpu.memory_space<vmem>>, vector<1x128x128xbf16>
    %12 = vector.shape_cast %11 : vector<1x128x128xbf16> to vector<128x128xbf16>
    %cst_8 = arith.constant dense<0.000000e+00> : vector<8x128xf32>
    %13 = tpu.matmul %10, %12, %cst_8 {dimension_numbers = #tpu.dot_dimension_numbers<[1], [0], [0], [1], [0, 0, 1, 1], [], []>} : vector<8x128xbf16>, vector<128x128xbf16>, vector<8x128xf32> -> vector<8x128xf32>
    %c0_9 = arith.constant 0 : index
    %c0_10 = arith.constant 0 : index
    %c0_11 = arith.constant 0 : index
    %14 = vector.load %arg4[%c0_9, %c0_10, %c0_11] : memref<1x1x128xf32, #tpu.memory_space<vmem>>, vector<1x1x128xf32>
    %15 = vector.shape_cast %14 : vector<1x1x128xf32> to vector<1x128xf32>
    %c0_12 = arith.constant 0 : index
    %c0_13 = arith.constant 0 : index
    %c0_14 = arith.constant 0 : index
    %16 = vector.load %arg5[%c0_12, %c0_13, %c0_14] : memref<1x1x128xf32, #tpu.memory_space<vmem>>, vector<1x1x128xf32>
    %17 = vector.shape_cast %16 : vector<1x1x128xf32> to vector<1x128xf32>
    %cst_15 = arith.constant dense<0.000000e+00> : vector<128xf32>
    %18 = vector.multi_reduction <add>, %13, %cst_15 [0] : vector<8x128xf32> to vector<128xf32>
    %19 = vector.shape_cast %18 : vector<128xf32> to vector<1x128xf32>
    %cst_16 = arith.constant 8.000000e+00 : f32
    %20 = vector.broadcast %cst_16 : f32 to vector<1x128xf32>
    %21 = arith.divf %19, %20 : vector<1x128xf32>
    %22 = vector.broadcast %21 : vector<1x128xf32> to vector<8x128xf32>
    %23 = arith.subf %13, %22 : vector<8x128xf32>
    %24 = vector.broadcast %21 : vector<1x128xf32> to vector<8x128xf32>
    %25 = arith.subf %13, %24 : vector<8x128xf32>
    %26 = arith.mulf %23, %25 : vector<8x128xf32>
    %cst_17 = arith.constant dense<0.000000e+00> : vector<128xf32>
    %27 = vector.multi_reduction <add>, %26, %cst_17 [0] : vector<8x128xf32> to vector<128xf32>
    %28 = vector.shape_cast %27 : vector<128xf32> to vector<1x128xf32>
    %cst_18 = arith.constant 8.000000e+00 : f32
    %29 = vector.broadcast %cst_18 : f32 to vector<1x128xf32>
    %30 = arith.divf %28, %29 : vector<1x128xf32>
    %31 = vector.broadcast %21 : vector<1x128xf32> to vector<8x128xf32>
    %32 = arith.subf %13, %31 : vector<8x128xf32>
    %cst_19 = arith.constant 9.99999974E-6 : f32
    %33 = vector.broadcast %cst_19 : f32 to vector<1x128xf32>
    %34 = arith.addf %30, %33 : vector<1x128xf32>
    %35 = math.rsqrt %34 : vector<1x128xf32>
    %36 = vector.broadcast %35 : vector<1x128xf32> to vector<8x128xf32>
    %37 = arith.mulf %32, %36 : vector<8x128xf32>
    %38 = vector.broadcast %15 : vector<1x128xf32> to vector<8x128xf32>
    %39 = arith.mulf %37, %38 : vector<8x128xf32>
    %40 = vector.broadcast %17 : vector<1x128xf32> to vector<8x128xf32>
    %41 = arith.addf %39, %40 : vector<8x128xf32>
    %cst_20 = arith.constant 0.000000e+00 : f32
    %42 = vector.broadcast %cst_20 : f32 to vector<8x128xf32>
    %43 = arith.maximumf %41, %42 : vector<8x128xf32>
    %44 = arith.truncf %43 : vector<8x128xf32> to vector<8x128xbf16>
    %c0_21 = arith.constant 0 : index
    %c0_22 = arith.constant 0 : index
    %c0_23 = arith.constant 0 : index
    %45 = vector.load %arg6[%c0_21, %c0_22, %c0_23] : memref<1x128x128xbf16, #tpu.memory_space<vmem>>, vector<1x128x128xbf16>
    %46 = vector.shape_cast %45 : vector<1x128x128xbf16> to vector<128x128xbf16>
    %cst_24 = arith.constant dense<0.000000e+00> : vector<8x128xf32>
    %47 = tpu.matmul %44, %46, %cst_24 {dimension_numbers = #tpu.dot_dimension_numbers<[1], [0], [0], [1], [0, 0, 1, 1], [], []>} : vector<8x128xbf16>, vector<128x128xbf16>, vector<8x128xf32> -> vector<8x128xf32>
    %c0_25 = arith.constant 0 : index
    %c0_26 = arith.constant 0 : index
    %c0_27 = arith.constant 0 : index
    %48 = vector.load %arg7[%c0_25, %c0_26, %c0_27] : memref<1x1x128xf32, #tpu.memory_space<vmem>>, vector<1x1x128xf32>
    %49 = vector.shape_cast %48 : vector<1x1x128xf32> to vector<1x128xf32>
    %c0_28 = arith.constant 0 : index
    %c0_29 = arith.constant 0 : index
    %c0_30 = arith.constant 0 : index
    %50 = vector.load %arg8[%c0_28, %c0_29, %c0_30] : memref<1x1x128xf32, #tpu.memory_space<vmem>>, vector<1x1x128xf32>
    %51 = vector.shape_cast %50 : vector<1x1x128xf32> to vector<1x128xf32>
    %cst_31 = arith.constant dense<0.000000e+00> : vector<128xf32>
    %52 = vector.multi_reduction <add>, %47, %cst_31 [0] : vector<8x128xf32> to vector<128xf32>
    %53 = vector.shape_cast %52 : vector<128xf32> to vector<1x128xf32>
    %cst_32 = arith.constant 8.000000e+00 : f32
    %54 = vector.broadcast %cst_32 : f32 to vector<1x128xf32>
    %55 = arith.divf %53, %54 : vector<1x128xf32>
    %56 = vector.broadcast %55 : vector<1x128xf32> to vector<8x128xf32>
    %57 = arith.subf %47, %56 : vector<8x128xf32>
    %58 = vector.broadcast %55 : vector<1x128xf32> to vector<8x128xf32>
    %59 = arith.subf %47, %58 : vector<8x128xf32>
    %60 = arith.mulf %57, %59 : vector<8x128xf32>
    %cst_33 = arith.constant dense<0.000000e+00> : vector<128xf32>
    %61 = vector.multi_reduction <add>, %60, %cst_33 [0] : vector<8x128xf32> to vector<128xf32>
    %62 = vector.shape_cast %61 : vector<128xf32> to vector<1x128xf32>
    %cst_34 = arith.constant 8.000000e+00 : f32
    %63 = vector.broadcast %cst_34 : f32 to vector<1x128xf32>
    %64 = arith.divf %62, %63 : vector<1x128xf32>
    %65 = vector.broadcast %55 : vector<1x128xf32> to vector<8x128xf32>
    %66 = arith.subf %47, %65 : vector<8x128xf32>
    %cst_35 = arith.constant 9.99999974E-6 : f32
    %67 = vector.broadcast %cst_35 : f32 to vector<1x128xf32>
    %68 = arith.addf %64, %67 : vector<1x128xf32>
    %69 = math.rsqrt %68 : vector<1x128xf32>
    %70 = vector.broadcast %69 : vector<1x128xf32> to vector<8x128xf32>
    %71 = arith.mulf %66, %70 : vector<8x128xf32>
    %72 = vector.broadcast %49 : vector<1x128xf32> to vector<8x128xf32>
    %73 = arith.mulf %71, %72 : vector<8x128xf32>
    %74 = vector.broadcast %51 : vector<1x128xf32> to vector<8x128xf32>
    %75 = arith.addf %73, %74 : vector<8x128xf32>
    %cst_36 = arith.constant 0.000000e+00 : f32
    %76 = vector.broadcast %cst_36 : f32 to vector<8x128xf32>
    %77 = arith.maximumf %75, %76 : vector<8x128xf32>
    %c0_37 = arith.constant 0 : index
    %c0_38 = arith.constant 0 : index
    %78 = vector.load %arg10[%c0_37, %c0_38] : memref<8x128xf32, #tpu.memory_space<vmem>>, vector<8x128xf32>
    tpu.vector_store %arg10[%c0_37, %c0_38], %77 {strides = array<i32>} : memref<8x128xf32, #tpu.memory_space<vmem>>, vector<8x128xf32>,
    %c1_i32 = arith.constant 1 : i32
    %79 = arith.cmpi eq, %arg0, %c1_i32 : i32
    %80 = arith.extui %79 : i1 to i32
    %c0_i32_39 = arith.constant 0 : i32
    %81 = arith.cmpi ne, %80, %c0_i32_39 : i32
    scf.if %81 {
      %c0_40 = arith.constant 0 : index
      %c0_41 = arith.constant 0 : index
      %82 = vector.load %arg9[%c0_40, %c0_41] : memref<8x128xf32, #tpu.memory_space<vmem>>, vector<8x128xf32>
      tpu.vector_store %arg9[%c0_40, %c0_41], %77 {strides = array<i32>} : memref<8x128xf32, #tpu.memory_space<vmem>>, vector<8x128xf32>,
    } else {
    }
    return
  }
  func.func @transform_0(%arg0: i32) -> (i32, i32) {
    %c0_i32 = arith.constant 0 : i32
    %c0_i32_0 = arith.constant 0 : i32
    %c0_i32_1 = arith.constant 0 : i32
    return %c0_i32, %c0_i32_0 : i32, i32
  }
  func.func @transform_1(%arg0: i32) -> (i32, i32) {
    %c0_i32 = arith.constant 0 : i32
    %c0_i32_0 = arith.constant 0 : i32
    %c0_i32_1 = arith.constant 0 : i32
    return %c0_i32, %c0_i32_0 : i32, i32
  }
  func.func @transform_2(%arg0: i32) -> (i32, i32, i32) {
    %c0_i32 = arith.constant 0 : i32
    %c0_i32_0 = arith.constant 0 : i32
    %c0_i32_1 = arith.constant 0 : i32
    return %arg0, %c0_i32, %c0_i32_0 : i32, i32, i32
  }
  func.func @transform_3(%arg0: i32) -> (i32, i32, i32) {
    %c0_i32 = arith.constant 0 : i32
    %c0_i32_0 = arith.constant 0 : i32
    %c0_i32_1 = arith.constant 0 : i32
    return %arg0, %c0_i32, %c0_i32_0 : i32, i32, i32
  }
  func.func @transform_4(%arg0: i32) -> (i32, i32, i32) {
    %c0_i32 = arith.constant 0 : i32
    %c0_i32_0 = arith.constant 0 : i32
    %c0_i32_1 = arith.constant 0 : i32
    return %arg0, %c0_i32, %c0_i32_0 : i32, i32, i32
  }
  func.func @transform_5(%arg0: i32) -> (i32, i32, i32) {
    %c0_i32 = arith.constant 0 : i32
    %c0_i32_0 = arith.constant 0 : i32
    %c0_i32_1 = arith.constant 0 : i32
    return %arg0, %c0_i32, %c0_i32_0 : i32, i32, i32
  }
  func.func @transform_6(%arg0: i32) -> (i32, i32, i32) {
    %c0_i32 = arith.constant 0 : i32
    %c0_i32_0 = arith.constant 0 : i32
    %c0_i32_1 = arith.constant 0 : i32
    return %arg0, %c0_i32, %c0_i32_0 : i32, i32, i32
  }
  func.func @transform_7(%arg0: i32) -> (i32, i32, i32) {
    %c0_i32 = arith.constant 0 : i32
    %c0_i32_0 = arith.constant 0 : i32
    %c0_i32_1 = arith.constant 0 : i32
    return %arg0, %c0_i32, %c0_i32_0 : i32, i32, i32
  }
  func.func @transform_8(%arg0: i32) -> (i32, i32) {
    %c0_i32 = arith.constant 0 : i32
    %c0_i32_0 = arith.constant 0 : i32
    %c0_i32_1 = arith.constant 0 : i32
    return %c0_i32, %c0_i32_0 : i32, i32
  }
}

</mosaic_0001>

<bundles_post_ra>
// kernel: tpu_custom_call.1
= control target key start
LH: loop header
LB: loop body
LE: loop exit
PB: predicated region body
PF: predicated region fallthrough
CT: control target
= control target key end

     0   :  { %s1688_s0 = inlined_call_operand.hbm [shape: bf16[8,8], index: 0, kind: input, shape index: {}]   ;;  %s1689_s1 = inlined_call_operand.hbm [shape: f32[8,128], index: 1, kind: input, shape index: {}]   ;;  %s1690_s2 = inlined_call_operand.hbm [shape: bf16[2,128,128], index: 2, kind: input, shape index: {}]   ;;  %s1691_s3 = inlined_call_operand.vmem [shape: f32[2,1,128], index: 3, kind: input, shape index: {}]   ;;  %s1692_s4 = inlined_call_operand.vmem [shape: f32[2,1,128], index: 4, kind: input, shape index: {}]   ;;  %s1693_s5 = inlined_call_operand.hbm [shape: bf16[2,128,128], index: 5, kind: input, shape index: {}]   ;;  %s1694_s6 = inlined_call_operand.vmem [shape: f32[2,1,128], index: 6, kind: input, shape index: {}]   ;;  %s1695_s7 = inlined_call_operand.vmem [shape: f32[2,1,128], index: 7, kind: input, shape index: {}]   ;;  %s1696_s8 = inlined_call_operand.hbm [shape: f32[8,128], index: 8, kind: output, shape index: {}]  }
   0x1   :  { %1708 = sst [smem:[#allocation18_spill]] %s1688_s0 }
   0x2   :  { %1709 = sst [smem:[#allocation19_spill]] %s1690_s2 }
   0x3   :  { %1710 = sst [smem:[#allocation20_spill]] %s1695_s7 }
   0x4   :  { %1711 = sst [smem:[#allocation21_spill]] %s1696_s8 }
   0x5   :  { %13 = vsyncpa [#allocation4], 0 }
   0x6   :  { %14 = vsyncpa [#allocation7], 0 }
   0x7   :  { %15 = vsyncpa [#allocation5], 0  ;;  %s1358_s27 = smov 0   ;;  %s1360_s28 = smov 0  }
   0x8   :  { %s1362_s29 = smov 0   ;;  %s1364_s30 = smov 0  }
   0x9 LB: > { %1712 = sst [smem:[#allocation15_spill]] %s1298_s29  ;;  %s1377_s9 = sadd.s32 4294967295, %s1302_s30   ;;  %s1302_s30 = sphi %s1364_s30, %s1738_s30   ;;  %s1298_s29 = sphi %s1362_s29, %s1740_s29   ;;  %s1294_s28 = sphi %s1360_s28, %s1742_s28   ;;  %s1290_s27 = sphi %s1358_s27, %s1741_s27  }
   0xa   : > { %s1380_s10 = sadd.s32 1, %s1302_s30   ;;  %s70_s12 = sadd.s32 1, %s1298_s29 }
   0xb   : > { %1713 = sst [smem:[#allocation16_spill]] %s1380_s10  ;;  %s67_s11 = ssub.s32 %s1302_s30, %s1380_s10 }
   0xc   : > { %p68_p0 = scmp.eq.s32.totalorder %s67_s11, 0  ;;  %p77_p1 = scmp.ne.s32.totalorder %s1298_s29, %s1294_s28 }
   0xd   : > { %p78_p2 = scmp.eq.s32.totalorder %s1302_s30, 0  ;;  %p83_p3 = scmp.ne.s32.totalorder %s1294_s28, %s1290_s27 }
   0xe   : > { %s1390_s13 = scalar_select %p68_p0, %s1298_s29, %s70_s12  }
   0xf   : > { %p1392_p4 = por %p78_p2, %p77_p1  ;;  %p1697_p5 = scmp.eq.s32.totalorder %s1377_s9, 0 }
  0x10   : > { %1714 = sst [smem:[#allocation17_spill]] %s1390_s13  ;;  %p908_p6 = scmp.ge.s32.totalorder %s1302_s30, 1 }
  0x11   : > { %p245_p7 = scmp.lt.s32.totalorder %s1302_s30, 3  ;;  %p1401_p8 = por %p1697_p5, %p83_p3 }
  0x12   : > { %s1304_s17 = smov [#allocation3]   ;;  %p1050_p12 = scmp.lt.s32.totalorder %s1302_s30, 2 }
  0x13   : > { %s1716_s15 = scalar_select %p1401_p8, 1, 0 }
  0x14   : > { %p1406_p10 = pnand %p908_p6, %p245_p7  ;;  %s258_s18 = sshll.u32 %s1304_s17, 4  ;;  %s259_s18 = int_to_ptr.vmem [resolvable:$true] %s258_s18 }
  0x15   : > { %s280_s19 = sand.u32 1, %s1302_s30   ;;  %p1422_p0 = pnand %p1050_p12, %p1392_p4 }
  0x16   : > { %s1717_s16 = scalar_select %p1406_p10, 1, 0 }
  0x17   : > { %p1034_p11 = pneg %p1406_p10  ;;  %s282_s22 = sand.u32 1, %s1298_s29  }
  0x18   : > { %s1719_s21 = scalar_select %p1422_p0, 1, 0 }
  0x19   : > { %p1416_p13 = pnand %p1034_p11, %p1697_p5  ;;  %s1427_s23 = sshll.u32 %s282_s22, 6 }
  0x1a   : > { %s1720_s0 = sld [smem:[#allocation18_spill]] }
  0x1b   : > { %p1701_p2 = pneg %p1416_p13 }
  0x20   : > { %s1114_s26 = scalar_lea.hbm %s1720_s0, 64 }
  0x21   : > { %p1115_p1 = scmp.ne.s32.totalorder %s1720_s0, %s1114_s26  ;;  %p1121_p6 = scmp.lt.u32.totalorder %s1114_s26, %s1720_s0 }
  0x23   : > { %p1117_p3 = pnand %p1701_p2, %p1115_p1 }
  0x25   : > { %p1118_p4 = pneg %p1117_p3 }
  0x27   : > { %p1123_p7 = pnand %p1121_p6, %p1118_p4 }
  0x29   : > { %1126 = shalt.err (!%p1123_p7)
}
  0x2a   : > { %s1127_s17 = scalar_lea.vmem %s259_s18, 64  ;;  %p1135_p5 = scmp.lt.s32.totalorder %s259_s18, %s259_s18 }
  0x2b   : > { %p1128_p11 = scmp.ne.s32.totalorder %s259_s18, %s1127_s17  ;;  %p1136_p8 = scmp.lt.s32.totalorder %s1127_s17, %s1127_s17 }
  0x2d   : > { %p1130_p12 = pnand %p1128_p11, %p1701_p2  ;;  %p1137_p10 = por %p1136_p8, %p1135_p5 }
  0x2f   : > { %p1131_p9 = pneg %p1130_p12 }
  0x31   : > { %p1138_p0 = pnand %p1137_p10, %p1131_p9 }
  0x33   : > { %1141 = shalt.err (!%p1138_p0)
}
  0x34   : > { %1037 = dma.hbm_to_vmem [thread:$0]  (!%p1416_p13), %s1720_s0, 64, %s259_s18, [#allocation4]  }
  0x35   : > { %s950_s25 = sshll.u32 %s1302_s30, 10  ;;  %s284_s26 = scalar_lea.vmem [#allocation8], %s1427_s23 }
  0x36   : > { %s291_s27 = sshll.u32 %s284_s26, 4  ;;  %s1721_s2 = sld [smem:[#allocation19_spill]]  ;;  %s1460_s27 = int_to_ptr.vmem [resolvable:$true] %s291_s27 }
  0x37   : > { %s1462_s17 = scalar_lea.sflag [#allocation4], %s280_s19  ;;  %p1722_p8 = scmp.ne.s32.totalorder %s1719_s21, 0 }
  0x39   : > { %p1706_p9 = pneg %p1722_p8 }
  0x3c   : > { %s1458_s14 = scalar_lea.hbm %s1721_s2, %s950_s25  ;;  %s1147_s26 = scalar_lea.hbm %s1721_s2, 2048 }
  0x3d   : > { %s1142_s22 = scalar_lea.hbm %s1458_s14, 1024  ;;  %p1148_p1 = scmp.lt.u32.totalorder %s1458_s14, %s1721_s2 }
  0x3e   : > { %p1143_p5 = scmp.ne.s32.totalorder %s1458_s14, %s1142_s22  ;;  %p1149_p3 = scmp.lt.u32.totalorder %s1147_s26, %s1142_s22 }
  0x3f   : > { %p1151_p6 = scmp.lt.u32.totalorder %s1142_s22, %s1458_s14 }
  0x40   : > { %p1145_p10 = pnand %p1706_p9, %p1143_p5  ;;  %p1150_p4 = por %p1149_p3, %p1148_p1 }
  0x42   : > { %p1146_p0 = pneg %p1145_p10  ;;  %p1152_p7 = por %p1151_p6, %p1150_p4 }
  0x44   : > { %p1153_p11 = pnand %p1152_p7, %p1146_p0 }
  0x46   : > { %1156 = shalt.err (!%p1153_p11)
}
  0x47   : > { %s1157_s19 = scalar_lea.vmem %s1460_s27, 1024  ;;  %s1305_s18 = smov [#allocation8]  }
  0x48   : > { %p1158_p12 = scmp.ne.s32.totalorder %s1460_s27, %s1157_s19  ;;  %s1162_s24 = sshll.u32 %s1305_s18, 4  ;;  %s1163_s24 = int_to_ptr.vmem [resolvable:$false] %s1162_s24 }
  0x49   : > { %s1164_s11 = scalar_lea.vmem %s1163_s24, 2048  ;;  %p1165_p2 = scmp.lt.s32.totalorder %s1460_s27, %s1163_s24 }
  0x4a   : > { %p1160_p5 = pnand %p1158_p12, %p1706_p9  ;;  %p1166_p1 = scmp.lt.s32.totalorder %s1164_s11, %s1157_s19 }
  0x4c   : > { %p1161_p10 = pneg %p1160_p5  ;;  %p1167_p3 = por %p1166_p1, %p1165_p2 }
  0x4e   : > { %p1168_p4 = pnand %p1167_p3, %p1161_p10 }
  0x50   : > { %1171 = shalt.err (!%p1168_p4)
}
  0x51   : > { %s1306_s22 = smov 64   ;;  %s1307_s26 = smov 4  }
  0x52   : > { %1044 = dma.hbm_to_vmem [thread:$0]  (!%p1722_p8), %s1458_s14, 1024, %s1460_s27, %s1462_s17, %s1306_s22, %s1306_s22, %s1307_s26  }
  0x53   : > { %s1308_s12 = smov [#allocation6]   ;;  %s1498_s11 = scalar_lea.hbm %s1693_s5, %s950_s25 }
  0x54   : > { %s269_s18 = sshll.u32 %s1308_s12, 4  ;;  %s317_s0 = scalar_lea.vmem [#allocation9], %s1427_s23  ;;  %s270_s18 = int_to_ptr.vmem [resolvable:$true] %s269_s18 }
  0x55   : > { %s324_s2 = sshll.u32 %s317_s0, 4  ;;  %s1172_s10 = scalar_lea.hbm %s1689_s1, 128  ;;  %s1521_s2 = int_to_ptr.vmem [resolvable:$true] %s324_s2 }
  0x56   : > { %p1173_p2 = scmp.ne.s32.totalorder %s1689_s1, %s1172_s10  ;;  %p1723_p0 = pneg %p1416_p13 }
  0x57   : > { %p1179_p11 = scmp.lt.u32.totalorder %s1172_s10, %s1689_s1 }
  0x58   : > { %p1175_p6 = pnand %p1173_p2, %p1723_p0 }
  0x5a   : > { %p1176_p7 = pneg %p1175_p6 }
  0x5c   : > { %p1181_p12 = pnand %p1179_p11, %p1176_p7 }
  0x5e   : > { %1184 = shalt.err (!%p1181_p12)
}
  0x5f   : > { %s1185_s23 = scalar_lea.vmem %s270_s18, 128  ;;  %p1724_p10 = pmov %p1723_p0 }
  0x60   : > { %p1186_p5 = scmp.ne.s32.totalorder %s270_s18, %s1185_s23  ;;  %p1193_p4 = scmp.lt.s32.totalorder %s270_s18, %s270_s18 }
  0x61   : > { %p1194_p9 = scmp.lt.s32.totalorder %s1185_s23, %s1185_s23 }
  0x62   : > { %p1188_p1 = pnand %p1186_p5, %p1724_p10 }
  0x63   : > { %p1195_p8 = por %p1194_p9, %p1193_p4 }
  0x64   : > { %p1189_p3 = pneg %p1188_p1 }
  0x66   : > { %p1196_p0 = pnand %p1195_p8, %p1189_p3 }
  0x68   : > { %1199 = shalt.err (!%p1196_p0)
}
  0x69   : > { %1040 = dma.hbm_to_vmem [thread:$0]  (!%p1416_p13), %s1689_s1, 128, %s270_s18, [#allocation7]  }
  0x6a   : > { %s1200_s8 = scalar_lea.hbm %s1498_s11, 1024  ;;  %p1725_p6 = scmp.ne.s32.totalorder %s1719_s21, 0 }
  0x6b   : > { %p1201_p2 = scmp.ne.s32.totalorder %s1498_s11, %s1200_s8  ;;  %s1205_s13 = scalar_lea.hbm %s1693_s5, 2048 }
  0x6c   : > { %p1726_p7 = pneg %p1725_p6  ;;  %p1206_p11 = scmp.lt.u32.totalorder %s1498_s11, %s1693_s5 }
  0x6d   : > { %p1207_p12 = scmp.lt.u32.totalorder %s1205_s13, %s1200_s8  ;;  %p1209_p10 = scmp.lt.u32.totalorder %s1200_s8, %s1498_s11 }
  0x6e   : > { %p1203_p9 = pnand %p1201_p2, %p1726_p7 }
  0x6f   : > { %p1208_p5 = por %p1207_p12, %p1206_p11 }
  0x70   : > { %p1204_p8 = pneg %p1203_p9 }
  0x71   : > { %p1210_p13 = por %p1209_p10, %p1208_p5 }
  0x73   : > { %p1211_p1 = pnand %p1210_p13, %p1204_p8 }
  0x75   : > { %1214 = shalt.err (!%p1211_p1)
}
  0x76   : > { %s1215_s14 = scalar_lea.vmem %s1521_s2, 1024  ;;  %p1727_p4 = pmov %p1726_p7 }
  0x77   : > { %p1216_p3 = scmp.ne.s32.totalorder %s1521_s2, %s1215_s14  ;;  %s1309_s12 = smov [#allocation9]  }
  0x78   : > { %s1220_s18 = sshll.u32 %s1309_s12, 4  ;;  %s1221_s18 = int_to_ptr.vmem [resolvable:$false] %s1220_s18 }
  0x79   : > { %p1218_p0 = pnand %p1216_p3, %p1727_p4  ;;  %s1222_s19 = scalar_lea.vmem %s1221_s18, 2048 }
  0x7a   : > { %p1223_p7 = scmp.lt.s32.totalorder %s1521_s2, %s1221_s18  ;;  %p1224_p9 = scmp.lt.s32.totalorder %s1222_s19, %s1215_s14 }
  0x7b   : > { %p1219_p2 = pneg %p1218_p0 }
  0x7c   : > { %p1225_p11 = por %p1224_p9, %p1223_p7 }
  0x7e   : > { %p1226_p12 = pnand %p1225_p11, %p1219_p2 }
  0x80   : > { %1229 = shalt.err (!%p1226_p12)
}
  0x81   : > { %1047 = dma.hbm_to_vmem [thread:$0]  (!%p1725_p6), %s1498_s11, 1024, %s1521_s2, %s1462_s17, %s1306_s22, %s1306_s22, %s1307_s26  }
  0x82   : > { %p1728_p8 = scmp.ne.s32.totalorder %s1717_s16, 0 }
  0x83   : > { %p1729_p5 = scmp.eq.s32.totalorder (!%p1728_p8), %s1377_s9, 0 }
  0x84   : > { %348 = sbr.rel (%p1728_p8) target bundleno = 946 (0x3b2), region = 52 }
  0x8b   : > { %1273 = dma.done.wait (%p1729_p5), [#allocation4], 64   ;;  %p1730_p10 = pmov %p1729_p5 }
  0x8c   : > { %p1731_p13 = pmov %p1729_p5 }
  0x8d   : > { %1275 = vsyncadd (%p1730_p10), [#allocation4], 4294967232 }
  0x8e   : > { %1277 = dma.done.wait (%p1731_p13), [#allocation7], 128   ;;  %p1732_p1 = pmov %p1729_p5 }
  0x8f   : > { %s358_s21 = sand.u32 1, %s1377_s9   ;;  %s360_s2 = sand.u32 1, %s1294_s28  }
  0x90   : > { %1279 = vsyncadd (%p1732_p1), [#allocation7], 4294967168  ;;  %s921_s17 = sshll.u32 %s360_s2, 6  ;;  %s359_s16 = scalar_lea.sflag [#allocation4], %s358_s21 }
  0x91   : > { %s1562_s22 = scalar_lea.vmem [#allocation8], %s921_s17  ;;  %p1733_p6 = scmp.ne.s32.totalorder %s1716_s15, 0 }
  0x93   : > { %1281 = dma.done.wait (%p1733_p6), %s359_s16, 2048  }
  0x94   : > { %1283 = vsyncadd (%p1733_p6), %s359_s16, 4294965248  ;;  %p416_p3 = scmp.lt.s32.totalorder %s1377_s9, 1  ;;  %s1734_s13 = sld [smem:[#allocation20_spill]] }
  0x95   : > { %s1588_s25 = scalar_lea.vmem [#allocation9], %s921_s17  ;;  %p1735_p4 = scmp.ne.s32.totalorder %s1377_s9, 0 }
  0x96   : > { %s1570_s26 = scalar_select %p416_p3, %s1377_s9, 1 }
  0x97   : > { %432 = sbr.rel (%p1735_p4) target bundleno = 158 (0x9e), region = 72  ;;  %v433_v0 = vld [vmem:[#allocation6] sm:$0xff] (!%p1735_p4) }
  0x98   : > { %s418_s30 = scalar_lea.vmem %s1691_s3, %s1570_s26  ;;  %s421_s0 = scalar_lea.vmem %s1692_s4, %s1570_s26  ;;  %434 = vst [vmem:[#allocation2] sm:$0xff] (!%p1735_p4), %v433_v0 }
  0x99   : > { %s424_s8 = scalar_lea.vmem %s1694_s6, %s1570_s26 }
  0x9a   : > { %s427_s20 = scalar_lea.vmem %s1734_s13, %s1570_s26 }
  0x9e PF: > { %vm442_vm0 = vcmask 1043456   ;;  %v1310_v2 = vmov 0.0   ;;  %vm1311_vm1 = vmmov 0   ;;  %v1094_v4 = vld [vmem:[%s1562_s22] sm:$0xff]   ;;  %v436_v5 = vld [vmem:[#allocation3] sm:$0xf] }
  0x9f   : > { %v435_v1 = vld [vmem:[#allocation2] sm:$0xff]  ;;  %972 = vmatprep.subr.bf16.mxu0 %v1310_v2  ;;  %974 = vmatprep.mubr.msk.bf16.mxu0 %vm1311_vm1, %v1310_v2  ;;  %vm438_vm2 = vcmask 64512   ;;  %v1097_v9 = vld [vmem:[%s1562_s22 + $0x18] sm:$0xff]   ;;  %v1098_v10 = vld [vmem:[%s1562_s22 + $0x20] sm:$0xff]   ;;  %p945_p0 = scmp.ne.s32.totalorder %s1377_s9, 1 }
  0xa0   : > { %v437_v3 = vpack.c.bf16 %v435_v1, %v435_v1  ;;  %978 = vmatprep.subr.bf16.mxu1 %v1310_v2  ;;  %994 = vmatprep.mubr.msk.bf16.mxu1 %vm1311_vm1, %v1310_v2  ;;  %v1095_v7 = vld [vmem:[%s1562_s22 + $0x8] sm:$0xff]   ;;  %v1096_v8 = vld [vmem:[%s1562_s22 + $0x10] sm:$0xff]   ;;  %v1101_v13 = vld [vmem:[%s1562_s22 + $0x38] sm:$0xff]  }
  0xa1   : > { %979 = vmatpush3.bf16.msra.mxu1 %v1094_v4  ;;  %v1099_v11 = vld [vmem:[%s1562_s22 + $0x28] sm:$0xff]   ;;  %v1100_v12 = vld [vmem:[%s1562_s22 + $0x30] sm:$0xff]   ;;  %v1102_v20 = vld [vmem:[%s1588_s25] sm:$0xff]  }
  0xa2   : > { %v444_v6 = vsel %vm442_vm0, %v437_v3, 0  ;;  %980 = vmatprep.subr.bf16.mxu1 %v1310_v2  ;;  %v1103_v21 = vld [vmem:[%s1588_s25 + $0x8] sm:$0xff]   ;;  %v1104_v22 = vld [vmem:[%s1588_s25 + $0x10] sm:$0xff]   ;;  %v1105_v23 = vld [vmem:[%s1588_s25 + $0x18] sm:$0xff]  }
  0xa3   : > { %973 = vmatpush3.bf16.msra.mxu0 %v444_v6  ;;  %v1106_v24 = vld [vmem:[%s1588_s25 + $0x20] sm:$0xff]   ;;  %v1107_v25 = vld [vmem:[%s1588_s25 + $0x28] sm:$0xff]   ;;  %v1108_v26 = vld [vmem:[%s1588_s25 + $0x30] sm:$0xff]  }
  0xa4   : > { %998 = vmatprep.subr.bf16.mxu0 %v1310_v2  ;;  %v1109_v27 = vld [vmem:[%s1588_s25 + $0x38] sm:$0xff]   ;;  %v933_v50 = vld [vmem:[%s418_s30] ss:$0 sm:$0xff] }
  0xa5   : > { %981 = vmatpush3.bf16.msra.mxu1 %v1095_v7  ;;  %v934_v52 = vld [vmem:[%s421_s0] ss:$0 sm:$0xff] }
  0xa6   : > { %975 = vmatmul.mubr.msk.bf16.vlgmr.msra.gmra.mrb[0].mxu0 %vm438_vm2, %v436_v5  ;;  %982 = vmatprep.subr.bf16.mxu1 %v1310_v2 }
  0xa7   : > { %1014 = vmatprep.mubr.msk.bf16.mxu0 %vm1311_vm1, %v1310_v2  ;;  %999 = vmatpush3.bf16.msra.mxu0 %v1102_v20 }
  0xa8   : > { %1000 = vmatprep.subr.bf16.mxu0 %v1310_v2 }
  0xa9   : > { %983 = vmatpush3.bf16.msra.mxu1 %v1096_v8 }
  0xaa   : > { %984 = vmatprep.subr.bf16.mxu1 %v1310_v2 }
  0xab   : > { %1001 = vmatpush3.bf16.msra.mxu0 %v1103_v21 }
  0xac   : > { %1002 = vmatprep.subr.bf16.mxu0 %v1310_v2 }
  0xad   : > { %985 = vmatpush3.bf16.msra.mxu1 %v1097_v9 }
  0xae   : > { %986 = vmatprep.subr.bf16.mxu1 %v1310_v2 }
  0xaf   : > { %1003 = vmatpush3.bf16.msra.mxu0 %v1104_v22 }
  0xb0   : > { %1004 = vmatprep.subr.bf16.mxu0 %v1310_v2 }
  0xb1   : > { %987 = vmatpush3.bf16.msra.mxu1 %v1098_v10 }
  0xb2   : > { %988 = vmatprep.subr.bf16.mxu1 %v1310_v2 }
  0xb3   : > { %1005 = vmatpush3.bf16.msra.mxu0 %v1105_v23 }
  0xb4   : > { %1006 = vmatprep.subr.bf16.mxu0 %v1310_v2 }
  0xb5   : > { %989 = vmatpush3.bf16.msra.mxu1 %v1099_v11 }
  0xb6   : > { %990 = vmatprep.subr.bf16.mxu1 %v1310_v2 }
  0xb7   : > { %1007 = vmatpush3.bf16.msra.mxu0 %v1106_v24 }
  0xb8   : > { %1008 = vmatprep.subr.bf16.mxu0 %v1310_v2 }
  0xb9   : > { %991 = vmatpush3.bf16.msra.mxu1 %v1100_v12 }
  0xba   : > { %992 = vmatprep.subr.bf16.mxu1 %v1310_v2 }
  0xbb   : > { %1009 = vmatpush3.bf16.msra.mxu0 %v1107_v25 }
  0xbc   : > { %1010 = vmatprep.subr.bf16.mxu0 %v1310_v2 }
  0xbd   : > { %993 = vmatpush3.bf16.msra.mxu1 %v1101_v13 }
  0xbf   : > { %1011 = vmatpush3.bf16.msra.mxu0 %v1108_v26 }
  0xc0   : > { %1012 = vmatprep.subr.bf16.mxu0 %v1310_v2 }
  0xc3   : > { %1013 = vmatpush3.bf16.msra.mxu0 %v1109_v27 }
 0x179   : > { %v480_v14 = vpop.f32.mrb[0].mxu0 }
 0x17a   : > { %v481_v15 = vadd.f32 %v480_v14, %v435_v1  ;;  %v976_v16 = vpop.f32.mrb[1].mxu0 }
 0x17b   : > { %v483_v17 = vpop.f32.mrb[2].mxu0 }
 0x17c   : > { %v486_v18 = vpack.c.bf16 %v481_v15, %v481_v15  ;;  %v977_v19 = vpop.f32.mrb[3].mxu0  ;;  %v943_v15 = vld [vmem:[%s424_s8] ss:$0 sm:$0xff] }
 0x17d   : > { %v944_v17 = vld [vmem:[%s427_s20] ss:$0 sm:$0xff] }
 0x17e   : > { %995 = vmatmul.mubr.bf16.vlgmr.msra.gmra.mrb[0].mxu1 %v486_v18 }
 0x251   : > { %v585_v28 = vpop.f32.mrb[0].mxu1 }
 0x252   : > { %v593_v29 = vrot.slane %v585_v28, 4  ;;  %v996_v30 = vpop.f32.mrb[1].mxu1 }
 0x253   : > { %v588_v31 = vpop.f32.mrb[2].mxu1 }
 0x254   : > { %v594_v32 = vadd.f32 %v593_v29, %v585_v28  ;;  %v997_v33 = vpop.f32.mrb[3].mxu1 }
 0x256   : > { %v595_v34 = vrot.slane %v594_v32, 2 }
 0x258   : > { %v596_v35 = vadd.f32 %v595_v34, %v594_v32 }
 0x25a   : > { %v597_v36 = vrot.slane %v596_v35, 1 }
 0x25c   : > { %v598_v37 = vadd.f32 %v597_v36, %v596_v35 }
 0x25e   : > { %v600_v38 = vmul.f32 0.125, %v598_v37 }
 0x260   : > { %v601_v39 = vsub.f32 %v585_v28, %v600_v38 }
 0x262   : > { %v602_v40 = vmul.f32 %v601_v39, %v601_v39 }
 0x264   : > { %v603_v41 = vrot.slane %v602_v40, 4 }
 0x266   : > { %v604_v42 = vadd.f32 %v603_v41, %v602_v40 }
 0x268   : > { %v605_v43 = vrot.slane %v604_v42, 2 }
 0x26a   : > { %v606_v44 = vadd.f32 %v605_v43, %v604_v42 }
 0x26c   : > { %v607_v45 = vrot.slane %v606_v44, 1 }
 0x26e   : > { %v608_v46 = vadd.f32 %v607_v45, %v606_v44 }
 0x270   : > { %v609_v47 = vmul.f32 0.125, %v608_v46 }
 0x272   : > { %v610_v48 = vadd.f32 1e-05, %v609_v47 }
 0x274   : > { %1110 = vrsqrt.f32 %v610_v48 }
 0x27e   : > { %v1111_v49 = vpop.eup %1110 }
 0x27f   : > { %v612_v51 = vmul.f32 %v1111_v49, %v601_v39 }
 0x281   : > { %v619_v53 = vmul.f32 %v933_v50, %v612_v51 }
 0x283   : > { %v626_v54 = vadd.f32 %v934_v52, %v619_v53 }
 0x285   : > { %v627_v55 = vmax.f32 %v626_v54, 0.0 }
 0x287   : > { %v628_v56 = vpack.c.bf16 %v627_v55, %v627_v55 }
 0x289   : > { %1015 = vmatmul.mubr.bf16.vlgmr.msra.gmra.mrb[4].mxu0 %v628_v56 }
 0x35c   : > { %v727_v57 = vpop.f32.mrb[4].mxu0 }
 0x35d   : > { %v735_v58 = vrot.slane %v727_v57, 4  ;;  %v1016_v59 = vpop.f32.mrb[5].mxu0 }
 0x35e   : > { %v730_v60 = vpop.f32.mrb[6].mxu0 }
 0x35f   : > { %v736_v61 = vadd.f32 %v735_v58, %v727_v57  ;;  %v1017_v62 = vpop.f32.mrb[7].mxu0 }
 0x361   : > { %v737_v63 = vrot.slane %v736_v61, 2 }
 0x363   : > { %v738_v0 = vadd.f32 %v737_v63, %v736_v61 }
 0x365   : > { %v739_v1 = vrot.slane %v738_v0, 1 }
 0x367   : > { %v740_v2 = vadd.f32 %v739_v1, %v738_v0 }
 0x369   : > { %v741_v3 = vmul.f32 0.125, %v740_v2 }
 0x36b   : > { %v742_v4 = vsub.f32 %v727_v57, %v741_v3 }
 0x36d   : > { %v743_v5 = vmul.f32 %v742_v4, %v742_v4 }
 0x36f   : > { %v744_v6 = vrot.slane %v743_v5, 4 }
 0x371   : > { %v745_v7 = vadd.f32 %v744_v6, %v743_v5 }
 0x373   : > { %v746_v8 = vrot.slane %v745_v7, 2 }
 0x375   : > { %v747_v9 = vadd.f32 %v746_v8, %v745_v7 }
 0x377   : > { %v748_v10 = vrot.slane %v747_v9, 1 }
 0x379   : > { %v749_v11 = vadd.f32 %v748_v10, %v747_v9 }
 0x37b   : > { %v750_v12 = vmul.f32 0.125, %v749_v11 }
 0x37d   : > { %v751_v13 = vadd.f32 1e-05, %v750_v12 }
 0x37f   : > { %1112 = vrsqrt.f32 %v751_v13 }
 0x389   : > { %v1113_v14 = vpop.eup %1112 }
 0x38a   : > { %v753_v16 = vmul.f32 %v1113_v14, %v742_v4 }
 0x38c   : > { %v760_v18 = vmul.f32 %v943_v15, %v753_v16  ;;  %773 = sbr.rel (%p945_p0) target bundleno = 915 (0x393), region = 76 }
 0x38e   : > { %v767_v19 = vadd.f32 %v944_v17, %v760_v18 }
 0x390   : > { %v768_v20 = vmax.f32 %v767_v19, 0.0 }
 0x392   : > { %769 = vst [vmem:[#allocation2] sm:$0xff] %v768_v20  ;;  %774 = vst [vmem:[#allocation10] sm:$0xff] (!%p945_p0), %v768_v20 }
 0x393 PF: > { %p1053_p2 = scmp.eq.s32.totalorder %s1377_s9, 1  ;;  %s1312_s24 = smov [#allocation10]  }
 0x394   : > { %s782_s11 = sshll.u32 %s1312_s24, 4  ;;  %s783_s11 = int_to_ptr.vmem [resolvable:$true] %s782_s11 }
 0x395   : > { %s1230_s30 = scalar_lea.vmem %s783_s11, 128  ;;  %p1237_p12 = scmp.lt.s32.totalorder %s783_s11, %s783_s11 }
 0x396   : > { %p1231_p7 = scmp.ne.s32.totalorder %s783_s11, %s1230_s30  ;;  %p1238_p8 = scmp.lt.s32.totalorder %s1230_s30, %s1230_s30 }
 0x398   : > { %p1232_p9 = pnand %p1231_p7, %p1053_p2  ;;  %p1239_p5 = por %p1238_p8, %p1237_p12 }
 0x39a   : > { %p1233_p11 = pneg %p1232_p9 }
 0x39c   : > { %p1240_p10 = pnand %p1239_p5, %p1233_p11 }
 0x39e   : > { %1243 = shalt.err (!%p1240_p10)
}
 0x39f   : > { %s1737_s23 = sld [smem:[#allocation21_spill]] }
 0x3a5   : > { %s1244_s0 = scalar_lea.hbm %s1737_s23, 128 }
 0x3a6   : > { %p1245_p13 = scmp.ne.s32.totalorder %s1737_s23, %s1244_s0  ;;  %p1250_p3 = scmp.lt.u32.totalorder %s1244_s0, %s1737_s23 }
 0x3a8   : > { %p1246_p1 = pnand %p1245_p13, %p1053_p2 }
 0x3aa   : > { %p1247_p6 = pneg %p1246_p1 }
 0x3ac   : > { %p1252_p4 = pnand %p1250_p3, %p1247_p6 }
 0x3ae   : > { %1255 = shalt.err (!%p1252_p4)
}
 0x3af   : > { %1031 = dma.vmem_to_hbm [thread:$0]  (%p1053_p2), %s783_s11, 128, %s1737_s23, [#allocation5]  }
 0x3b0   : > { %1285 = dma.done.wait (%p1053_p2), [#allocation5], 128  }
 0x3b1   : > { %1287 = vsyncadd (%p1053_p2), [#allocation5], 4294967168 }
 0x3b2 PF: > { %s1738_s30 = sld [smem:[#allocation16_spill]]  ;;  %s1739_s20 = sld [smem:[#allocation15_spill]] }
 0x3b3   : > { %s1740_s29 = sld [smem:[#allocation17_spill]]  ;;  %s1741_s27 = smov %s1294_s28 }
 0x3b8   : > { %p18_p0 = scmp.ge.s32.totalorder %s1738_s30, 4   ;;  %s1742_s28 = smov %s1739_s20 }
 0x3ba   :  { %20 = sbr.rel (!%p18_p0) target bundleno = 9 (0x9), region = 127 }
 0x3c1   :  { %795 = vsyncpa [#allocation4], 1 }
 0x3c2   :  { %797 = vsyncpa [#allocation4 + $0x1], 1 }
 0x3c3   :  { %798 = vsyncpa [#allocation7], 1 }
 0x3c4   :  { %799 = vsyncpa [#allocation5], 1 }
 0x3c5   :  { %801 = vsyncpa [#allocation5 + $0x1], 1 }

</bundles_post_ra>
